<compile_context>
chip_gen: v7x
topology: tpu7x:2x2x1
jax: 0.10.0
libtpu: 0.0.40
codegen_flags: <defaults>
</compile_context>

<pallas_src>
import functools

import jax
import jax.numpy as jnp
from jax.experimental import pallas as pl
from jax.experimental.pallas import tpu as pltpu


def _round_up(x, m):
    return ((x + m - 1) // m) * m


def _vmem_capacity_bytes():
    """Device VMEM capacity; conservative fallback (v7x per-TC) if query fails."""
    try:
        return int(pltpu.get_tpu_info().vmem_capacity_bytes)
    except Exception:
        return 64 << 20


def _pick_tile_b(B, N_pad, W, D, vmem_budget_bytes):
    """Largest batch tile (multiple of 8) whose honest per-tile VMEM footprint fits
    the budget, capped so the grid has >= 2 steps when possible (v7x 2 TensorCores)."""
    per_b = (
        2 * (2 * N_pad * W)        # bf16 x block, double-buffered
        + 2 * 4 * (W + N_pad)      # f32 out / a blocks, double-buffered
        + 4 * N_pad * D            # f32 e intermediate (tb*N, D)
        + 4 * N_pad * W            # f32 upcast of x for the pooled multiply
        + 3 * 4 * N_pad            # logits / p / a
    )
    cap = max(8, (vmem_budget_bytes // max(per_b, 1)) // 8 * 8)
    b8 = _round_up(B, 8)
    tile_b = min(cap, b8)
    if b8 // tile_b < 2 and b8 >= 16:          # keep >= 2 grid steps for v7x
        tile_b = max(8, (b8 // 2) // 8 * 8)
    return tile_b


def attention_kernel(x_ref, w_ref, bw_ref, v_ref, out_ref, a_ref, *, n_valid):
    # x_ref:   (TILE_B, N_pad, W)  bf16  input tile
    # w_ref:   (W, D)              bf16  W.weight.T (shared across grid)
    # bw_ref:  (1, D)              f32   W.bias
    # v_ref:   (1, D)              f32   V.weight as a row vector
    # out_ref: (TILE_B, W)         f32   pooled output
    # a_ref:   (TILE_B, N_pad)     f32   softmax attention weights (lane-dense)
    tb, n, w = x_ref.shape
    d = w_ref.shape[1]

    # ---- W projection: one MXU matmul for the whole tile (bf16 in, f32 acc).
    #      N_pad is a multiple of 8, so this reshape is a pure view.
    x2 = x_ref[...].reshape(tb * n, w)                                 # (TB*N, W) bf16
    e = jnp.tanh(
        jnp.dot(x2, w_ref[...], preferred_element_type=jnp.float32) + bw_ref[...]
    )                                                                  # (TB*N, D) f32

    # ---- V projection as a VPU multiply + XLU lane reduce (lane-dense logits).
    #      V bias dropped: softmax shift-invariance => it cannot change a or pooled.
    logits = jnp.sum(e.reshape(tb, n, d) * v_ref[...], axis=-1)        # (TB, N) f32

    # ---- mask padded sequence positions (static branch; no-op when N % 8 == 0).
    if n_valid < n:
        col = jax.lax.broadcasted_iota(jnp.int32, (tb, n), 1)
        logits = jnp.where(col < n_valid, logits, -1e30)

    # ---- softmax over the sequence (lane) axis; exact normalization for `a`.
    m = jnp.max(logits, axis=-1, keepdims=True)                        # (TB, 1)
    p = jnp.exp(logits - m)                                            # (TB, N)
    a = p / jnp.sum(p, axis=-1, keepdims=True)                         # (TB, N)
    a_ref[...] = a

    # ---- weighted pooled sum over N (sublane-axis reduce), f32 accumulation.
    #      Re-read x_ref here: the tile is already resident; this shortens the f32
    #      live range instead of holding an upcast copy across the whole body.
    xf = x_ref[...].astype(jnp.float32)                                # (TB, N, W)
    out_ref[...] = jnp.sum(xf * a[:, :, None], axis=1)                 # (TB, W)


def attention_pallas(x, w_t, b_w, v, b_v=None, tile_b=None):
    """x: (B, N, w_size); w_t = W.weight.T (w_size, dim); b_w (dim,);
    v = V.weight.T (dim, 1); b_v (1,) is accepted but unused (softmax
    shift-invariance — it cannot change either output).
    Returns (pooled (B, w_size) f32, a (B, N, 1) f32)."""
    del b_v  # mathematically irrelevant to both outputs
    B, N, W = x.shape
    D = w_t.shape[1]

    N_pad = _round_up(N, 8)

    vmem_cap = _vmem_capacity_bytes()
    if tile_b is None:
        # ~40% of device VMEM for resident blocks/intermediates (leaves headroom
        # on v7x's 64 MiB while using big tiles on v5e/v6e's 128 MiB).
        tile_b = _pick_tile_b(B, N_pad, W, D, int(vmem_cap * 0.4))
    elif tile_b % 8 != 0:
        tile_b = _round_up(tile_b, 8)          # sublane rule for the output blocks
    B_pad = _round_up(max(B, tile_b), tile_b)

    # bf16 x in HBM: halves traffic of the dominant operand (kernel is HBM-bound).
    x_bf = x.astype(jnp.bfloat16)
    if (B_pad, N_pad) != (B, N):
        x_bf = jnp.pad(x_bf, ((0, B_pad - B), (0, N_pad - N), (0, 0)))

    w_bf16 = w_t.astype(jnp.bfloat16)                  # MXU operand; f32 accumulation
    bw2 = b_w.reshape(1, D).astype(jnp.float32)
    v_row = v.reshape(1, D).astype(jnp.float32)

    out_shape = (
        jax.ShapeDtypeStruct((B_pad, W), jnp.float32),
        jax.ShapeDtypeStruct((B_pad, N_pad), jnp.float32),   # lane-dense a
    )

    grid_spec = pltpu.PrefetchScalarGridSpec(
        num_scalar_prefetch=0,
        grid=(B_pad // tile_b,),
        in_specs=[
            pl.BlockSpec((tile_b, N_pad, W), lambda b: (b, 0, 0)),  # x batch tile
            pl.BlockSpec((W, D), lambda b: (0, 0)),                 # W weights (shared)
            pl.BlockSpec((1, D), lambda b: (0, 0)),                 # W bias
            pl.BlockSpec((1, D), lambda b: (0, 0)),                 # V weights (row)
        ],
        out_specs=[
            pl.BlockSpec((tile_b, W), lambda b: (b, 0)),
            pl.BlockSpec((tile_b, N_pad), lambda b: (b, 0)),
        ],
    )

    vmem_limit = min(max(32 << 20, int(vmem_cap * 3 // 4)), 96 << 20)

    pooled, a = pl.pallas_call(
        functools.partial(attention_kernel, n_valid=N),
        out_shape=out_shape,
        grid_spec=grid_spec,
        compiler_params=pltpu.CompilerParams(
            dimension_semantics=("parallel",),     # batch tiles shard across TCs (v7x)
            vmem_limit_bytes=vmem_limit,
        ),
    )(x_bf, w_bf16, bw2, v_row)

    return pooled[:B], a[:B, :N].reshape(B, N, 1)


def attention_ref(x, w_t, b_w, v, b_v):
    e = jnp.tanh(jnp.einsum("bnw,wd->bnd", x, w_t) + b_w)
    logits = jnp.einsum("bnd,do->bno", e, v) + b_v        # (B, N, 1)
    a = jax.nn.softmax(logits, axis=1)
    pooled = jnp.sum(x * a, axis=1)
    return pooled, a


if __name__ == "__main__":
    # small shapes consistent with the module
    B, N, W_SIZE, DIM = 16, 8, 32, 64

    key = jax.random.PRNGKey(0)
    kx, kw, kbw, kv, kbv = jax.random.split(key, 5)

    x = jax.random.normal(kx, (B, N, W_SIZE), dtype=jnp.float32)

    # nn.Linear params: W.weight (dim, w_size) -> pass W.weight.T; V.weight (1, dim) -> V.weight.T
    w_t = jax.random.normal(kw, (W_SIZE, DIM), dtype=jnp.float32) * 0.1
    b_w = jax.random.normal(kbw, (DIM,), dtype=jnp.float32) * 0.1
    v = jax.random.normal(kv, (DIM, 1), dtype=jnp.float32) * 0.1
    b_v = jax.random.normal(kbv, (1,), dtype=jnp.float32) * 0.1

    # auto tile selection -> tile_b=8, grid=(2,) here (>= 2 steps, exercises tiling)
    pooled, a = attention_pallas(x, w_t, b_w, v, b_v)
    jax.block_until_ready((pooled, a))

    pooled_r, a_r = attention_ref(x, w_t, b_w, v, b_v)

    # bf16 x / W operands => ~1e-3-level deviations; tolerances loosened accordingly.
    assert jnp.allclose(pooled, pooled_r, atol=2e-2, rtol=2e-2)
    assert jnp.allclose(a, a_r, atol=1e-2, rtol=1e-2)
    # exact normalization of the returned attention weights
    assert jnp.allclose(jnp.sum(a, axis=1), 1.0, atol=1e-5)

    print("KERNEL_OK")
</pallas_src>

<mosaic_0001>
module attributes {stable_mosaic.version = 11 : i64} {
  func.func @attention_kernel(%arg0: i32, %arg1: memref<8x8x32xbf16, #tpu.memory_space<vmem>>, %arg2: memref<32x64xbf16, #tpu.memory_space<vmem>>, %arg3: memref<1x64xf32, #tpu.memory_space<vmem>>, %arg4: memref<1x64xf32, #tpu.memory_space<vmem>>, %arg5: memref<8x32xf32, #tpu.memory_space<vmem>>, %arg6: memref<8x8xf32, #tpu.memory_space<vmem>>) attributes {dimension_semantics = [#tpu.dimension_semantics<parallel>], iteration_bounds = array<i64: 2>, scalar_prefetch = 0 : i64, scratch_operands = 0 : i64, tpu.core_type = #tpu.core_type<tc>, window_params = [{transform_indices = @transform_0, window_bounds = array<i64: 8, 8, 32>}, {pipeline_mode = #tpu.pipeline_mode<synchronous>, transform_indices = @transform_1, window_bounds = array<i64: 32, 64>}, {pipeline_mode = #tpu.pipeline_mode<synchronous>, transform_indices = @transform_2, window_bounds = array<i64: 1, 64>}, {pipeline_mode = #tpu.pipeline_mode<synchronous>, transform_indices = @transform_3, window_bounds = array<i64: 1, 64>}, {transform_indices = @transform_4, window_bounds = array<i64: 8, 32>}, {transform_indices = @transform_5, window_bounds = array<i64: 8, 8>}]} {
    %c0 = arith.constant 0 : index
    %c0_0 = arith.constant 0 : index
    %c0_1 = arith.constant 0 : index
    %0 = vector.load %arg1[%c0, %c0_0, %c0_1] : memref<8x8x32xbf16, #tpu.memory_space<vmem>>, vector<8x8x32xbf16>
    %1 = vector.shape_cast %0 : vector<8x8x32xbf16> to vector<64x32xbf16>
    %c0_2 = arith.constant 0 : index
    %c0_3 = arith.constant 0 : index
    %2 = vector.load %arg2[%c0_2, %c0_3] : memref<32x64xbf16, #tpu.memory_space<vmem>>, vector<32x64xbf16>
    %cst = arith.constant dense<0.000000e+00> : vector<64x64xf32>
    %3 = tpu.matmul %1, %2, %cst {dimension_numbers = #tpu.dot_dimension_numbers<[1], [0], [0], [1], [0, 0, 1, 1], [], []>} : vector<64x32xbf16>, vector<32x64xbf16>, vector<64x64xf32> -> vector<64x64xf32>
    %c0_4 = arith.constant 0 : index
    %c0_5 = arith.constant 0 : index
    %4 = vector.load %arg3[%c0_4, %c0_5] : memref<1x64xf32, #tpu.memory_space<vmem>>, vector<1x64xf32>
    %5 = vector.broadcast %4 : vector<1x64xf32> to vector<64x64xf32>
    %6 = arith.addf %3, %5 : vector<64x64xf32>
    %7 = math.tanh %6 : vector<64x64xf32>
    %8 = vector.shape_cast %7 : vector<64x64xf32> to vector<8x8x64xf32>
    %c0_6 = arith.constant 0 : index
    %c0_7 = arith.constant 0 : index
    %9 = vector.load %arg4[%c0_6, %c0_7] : memref<1x64xf32, #tpu.memory_space<vmem>>, vector<1x64xf32>
    %10 = vector.shape_cast %9 : vector<1x64xf32> to vector<1x1x64xf32>
    %11 = vector.broadcast %10 : vector<1x1x64xf32> to vector<8x8x64xf32>
    %12 = arith.mulf %8, %11 : vector<8x8x64xf32>
    %cst_8 = arith.constant dense<0.000000e+00> : vector<8x8xf32>
    %13 = vector.multi_reduction <add>, %12, %cst_8 [2] : vector<8x8x64xf32> to vector<8x8xf32>
    %cst_9 = arith.constant dense<0xFF800000> : vector<8xf32>
    %14 = vector.multi_reduction <maximumf>, %13, %cst_9 [1] : vector<8x8xf32> to vector<8xf32>
    %15 = vector.shape_cast %14 : vector<8xf32> to vector<8x1xf32>
    %16 = vector.broadcast %15 : vector<8x1xf32> to vector<8x8xf32>
    %17 = arith.subf %13, %16 : vector<8x8xf32>
    %18 = math.exp %17 : vector<8x8xf32>
    %cst_10 = arith.constant dense<0.000000e+00> : vector<8xf32>
    %19 = vector.multi_reduction <add>, %18, %cst_10 [1] : vector<8x8xf32> to vector<8xf32>
    %20 = vector.shape_cast %19 : vector<8xf32> to vector<8x1xf32>
    %21 = vector.broadcast %20 : vector<8x1xf32> to vector<8x8xf32>
    %22 = arith.divf %18, %21 : vector<8x8xf32>
    %c0_11 = arith.constant 0 : index
    %c0_12 = arith.constant 0 : index
    %23 = vector.load %arg6[%c0_11, %c0_12] : memref<8x8xf32, #tpu.memory_space<vmem>>, vector<8x8xf32>
    tpu.vector_store %arg6[%c0_11, %c0_12], %22 {strides = array<i32>} : memref<8x8xf32, #tpu.memory_space<vmem>>, vector<8x8xf32>,
    %c0_13 = arith.constant 0 : index
    %c0_14 = arith.constant 0 : index
    %c0_15 = arith.constant 0 : index
    %24 = vector.load %arg1[%c0_13, %c0_14, %c0_15] : memref<8x8x32xbf16, #tpu.memory_space<vmem>>, vector<8x8x32xbf16>
    %25 = arith.extf %24 : vector<8x8x32xbf16> to vector<8x8x32xf32>
    %26 = vector.shape_cast %22 : vector<8x8xf32> to vector<8x8x1xf32>
    %27 = vector.broadcast %26 : vector<8x8x1xf32> to vector<8x8x32xf32>
    %28 = arith.mulf %25, %27 : vector<8x8x32xf32>
    %cst_16 = arith.constant dense<0.000000e+00> : vector<8x32xf32>
    %29 = vector.multi_reduction <add>, %28, %cst_16 [1] : vector<8x8x32xf32> to vector<8x32xf32>
    %c0_17 = arith.constant 0 : index
    %c0_18 = arith.constant 0 : index
    %30 = vector.load %arg5[%c0_17, %c0_18] : memref<8x32xf32, #tpu.memory_space<vmem>>, vector<8x32xf32>
    tpu.vector_store %arg5[%c0_17, %c0_18], %29 {strides = array<i32>} : memref<8x32xf32, #tpu.memory_space<vmem>>, vector<8x32xf32>,
    return
  }
  func.func @transform_0(%arg0: i32) -> (i32, i32, i32) {
    %c0_i32 = arith.constant 0 : i32
    %c0_i32_0 = arith.constant 0 : i32
    %c0_i32_1 = arith.constant 0 : i32
    return %arg0, %c0_i32, %c0_i32_0 : i32, i32, i32
  }
  func.func @transform_1(%arg0: i32) -> (i32, i32) {
    %c0_i32 = arith.constant 0 : i32
    %c0_i32_0 = arith.constant 0 : i32
    %c0_i32_1 = arith.constant 0 : i32
    return %c0_i32, %c0_i32_0 : i32, i32
  }
  func.func @transform_2(%arg0: i32) -> (i32, i32) {
    %c0_i32 = arith.constant 0 : i32
    %c0_i32_0 = arith.constant 0 : i32
    %c0_i32_1 = arith.constant 0 : i32
    return %c0_i32, %c0_i32_0 : i32, i32
  }
  func.func @transform_3(%arg0: i32) -> (i32, i32) {
    %c0_i32 = arith.constant 0 : i32
    %c0_i32_0 = arith.constant 0 : i32
    %c0_i32_1 = arith.constant 0 : i32
    return %c0_i32, %c0_i32_0 : i32, i32
  }
  func.func @transform_4(%arg0: i32) -> (i32, i32) {
    %c0_i32 = arith.constant 0 : i32
    %c0_i32_0 = arith.constant 0 : i32
    return %arg0, %c0_i32 : i32, i32
  }
  func.func @transform_5(%arg0: i32) -> (i32, i32) {
    %c0_i32 = arith.constant 0 : i32
    %c0_i32_0 = arith.constant 0 : i32
    return %arg0, %c0_i32 : i32, i32
  }
}

</mosaic_0001>

<bundles_post_ra>
// kernel: tpu_custom_call.1
= control target key start
LH: loop header
LB: loop body
LE: loop exit
PB: predicated region body
PF: predicated region fallthrough
CT: control target
= control target key end

     0   :  { %11 = vsyncpa [#allocation3], 0  ;;  %s1746_s0 = inlined_call_operand.hbm [shape: bf16[16,8,32], index: 0, kind: input, shape index: {}]   ;;  %s1747_s1 = inlined_call_operand.hbm [shape: bf16[32,64], index: 1, kind: input, shape index: {}]   ;;  %s1748_s2 = inlined_call_operand.vmem [shape: f32[1,64], index: 2, kind: input, shape index: {}]   ;;  %s1749_s3 = inlined_call_operand.vmem [shape: f32[1,64], index: 3, kind: input, shape index: {}]   ;;  %s1750_s4 = inlined_call_operand.hbm [shape: f32[16,32], index: 4, kind: output, shape index: {0}]   ;;  %s1751_s5 = inlined_call_operand.vmem [shape: f32[16,8], index: 5, kind: output, shape index: {1}]  }
   0x1   :  { %13 = vsyncpa [#allocation3 + $0x1], 0 }
   0x2   :  { %14 = vsyncpa [#allocation6], 0 }
   0x3   :  { %15 = vsyncpa [#allocation4], 0 }
   0x4   :  { %17 = vsyncpa [#allocation4 + $0x1], 0  ;;  %s1361_s18 = smov 0   ;;  %s1363_s19 = smov 0  }
   0x5   :  { %s1365_s20 = smov 0   ;;  %s1367_s21 = smov 0  }
   0x6 LB: > { %s1382_s22 = sadd.s32 4294967295, %s1323_s21   ;;  %s1009_s23 = sadd.s32 4294967294, %s1323_s21   ;;  %s1323_s21 = sphi %s1367_s21, %s1771_s21   ;;  %s1319_s20 = sphi %s1365_s20, %s1770_s20   ;;  %s1315_s19 = sphi %s1363_s19, %s1769_s19   ;;  %s1311_s18 = sphi %s1361_s18, %s1768_s18  }
   0x7   : > { %p43_p0 = scmp.ne.s32.totalorder %s1315_s19, %s1311_s18  ;;  %p1752_p1 = scmp.eq.s32.totalorder %s1382_s22, 0 }
   0x8   : > { %p136_p3 = scmp.eq.s32.totalorder %s1009_s23, 1  ;;  %p1010_p5 = scmp.ge.s32.totalorder %s1323_s21, 1 }
   0x9   : > { %p1391_p4 = por %p1752_p1, %p43_p0  ;;  %p169_p7 = scmp.lt.s32.totalorder %s1323_s21, 3 }
   0xa   : > { %p1396_p6 = por %p136_p3, %p43_p0  ;;  %s1325_s27 = smov [#allocation5]  }
   0xb   : > { %s1755_s24 = scalar_select %p1391_p4, 1, 0 }
   0xc   : > { %s1756_s25 = scalar_select %p1396_p6, 1, 0 }
   0xd   : > { %p1401_p8 = pnand %p1010_p5, %p169_p7  ;;  %s181_s28 = sshll.u32 %s1325_s27, 4  ;;  %s1405_s28 = int_to_ptr.vmem [resolvable:$true] %s181_s28 }
   0xe   : > { %s1417_s30 = sadd.s32 1, %s1323_s21   ;;  %s30_s6 = sadd.s32 1, %s1319_s20 }
   0xf   : > { %s1757_s26 = scalar_select %p1401_p8, 1, 0 }
  0x10   : > { %p1087_p9 = pneg %p1401_p8  ;;  %s27_s7 = ssub.s32 %s1323_s21, %s1417_s30 }
  0x11   : > { %s1195_s10 = scalar_lea.hbm %s1747_s1, 256 }
  0x12   : > { %p1412_p11 = pnand %p1087_p9, %p1752_p1  ;;  %p1196_p12 = scmp.ne.s32.totalorder %s1747_s1, %s1195_s10 }
  0x13   : > { %p1202_p5 = scmp.lt.u32.totalorder %s1195_s10, %s1747_s1 }
  0x14   : > { %p1197_p13 = pneg %p1412_p11 }
  0x16   : > { %p1198_p0 = pnand %p1197_p13, %p1196_p12 }
  0x18   : > { %p1199_p3 = pneg %p1198_p0 }
  0x1a   : > { %p1204_p7 = pnand %p1202_p5, %p1199_p3 }
  0x1c   : > { %1207 = shalt.err (!%p1204_p7)
}
  0x1d   : > { %s1208_s15 = scalar_lea.vmem %s1405_s28, 256  ;;  %p1216_p2 = scmp.lt.s32.totalorder %s1405_s28, %s1405_s28 }
  0x1e   : > { %p1209_p9 = scmp.ne.s32.totalorder %s1405_s28, %s1208_s15  ;;  %p1217_p6 = scmp.lt.s32.totalorder %s1208_s15, %s1208_s15 }
  0x20   : > { %p1211_p10 = pnand %p1209_p9, %p1197_p13  ;;  %p1218_p4 = por %p1217_p6, %p1216_p2 }
  0x22   : > { %p1212_p1 = pneg %p1211_p10 }
  0x24   : > { %p1219_p8 = pnand %p1218_p4, %p1212_p1 }
  0x26   : > { %1222 = shalt.err (!%p1219_p8)
}
  0x27   : > { %s1326_s16 = smov 64   ;;  %s1327_s17 = smov 4  }
  0x28   : > { %1090 = dma.hbm_to_vmem [thread:$0]  (!%p1412_p11), %s1747_s1, 256, %s1405_s28, [#allocation6], %s1326_s16, %s1326_s16, %s1327_s17  }
  0x29   : > { %p28_p1 = scmp.eq.s32.totalorder %s27_s7, 0  ;;  %p37_p2 = scmp.ne.s32.totalorder %s1319_s20, %s1315_s19 }
  0x2a   : > { %p38_p4 = scmp.eq.s32.totalorder %s1323_s21, 0  ;;  %p1100_p6 = scmp.lt.s32.totalorder %s1323_s21, 2 }
  0x2b   : > { %s1451_s8 = scalar_select %p28_p1, %s1319_s20, %s30_s6  }
  0x2c   : > { %p39_p8 = por %p38_p4, %p37_p2  ;;  %p1759_p10 = scmp.eq.s32.totalorder %s1382_s22, 1 }
  0x2d   : > { %s201_s29 = sand.u32 1, %s1319_s20   ;;  %s1037_s10 = sshll.u32 %s1323_s21, 9 }
  0x2e   : > { %p1455_p12 = por %p1759_p10, %p37_p2  ;;  %s1013_s11 = sshll.u32 %s201_s29, 5 }
  0x2f   : > { %s1464_s14 = scalar_lea.hbm %s1746_s0, %s1037_s10  ;;  %s205_s28 = scalar_lea.vmem [#allocation2], %s1013_s11 }
  0x30   : > { %s212_s6 = sshll.u32 %s205_s28, 4  ;;  %p1466_p11 = pnand %p1100_p6, %p39_p8  ;;  %s1470_s6 = int_to_ptr.vmem [resolvable:$true] %s212_s6 }
  0x31   : > { %s1472_s15 = scalar_lea.sflag [#allocation3], %s201_s29  ;;  %s1223_s23 = scalar_lea.hbm %s1464_s14, 512 }
  0x32   : > { %p1224_p13 = scmp.ne.s32.totalorder %s1464_s14, %s1223_s23  ;;  %p1225_p0 = pneg %p1466_p11 }
  0x33   : > { %s1228_s11 = scalar_lea.hbm %s1746_s0, 1024  ;;  %p1229_p7 = scmp.lt.u32.totalorder %s1464_s14, %s1746_s0 }
  0x34   : > { %p1226_p3 = pnand %p1225_p0, %p1224_p13  ;;  %p1230_p9 = scmp.lt.u32.totalorder %s1228_s11, %s1223_s23 }
  0x35   : > { %p1232_p2 = scmp.lt.u32.totalorder %s1223_s23, %s1464_s14 }
  0x36   : > { %p1227_p5 = pneg %p1226_p3  ;;  %p1231_p1 = por %p1230_p9, %p1229_p7 }
  0x38   : > { %p1233_p4 = por %p1232_p2, %p1231_p1 }
  0x3a   : > { %p1234_p6 = pnand %p1233_p4, %p1227_p5 }
  0x3c   : > { %1237 = shalt.err (!%p1234_p6)
}
  0x3d   : > { %s1238_s29 = scalar_lea.vmem %s1470_s6, 512  ;;  %s1328_s28 = smov [#allocation2]  }
  0x3e   : > { %p1239_p8 = scmp.ne.s32.totalorder %s1470_s6, %s1238_s29  ;;  %s1243_s27 = sshll.u32 %s1328_s28, 4  ;;  %s1244_s27 = int_to_ptr.vmem [resolvable:$false] %s1243_s27 }
  0x3f   : > { %s1245_s10 = scalar_lea.vmem %s1244_s27, 1024  ;;  %p1246_p3 = scmp.lt.s32.totalorder %s1470_s6, %s1244_s27 }
  0x40   : > { %p1241_p10 = pnand %p1239_p8, %p1225_p0  ;;  %p1247_p7 = scmp.lt.s32.totalorder %s1245_s10, %s1238_s29 }
  0x42   : > { %p1242_p13 = pneg %p1241_p10  ;;  %p1248_p9 = por %p1247_p7, %p1246_p3 }
  0x44   : > { %p1249_p1 = pnand %p1248_p9, %p1242_p13 }
  0x46   : > { %1252 = shalt.err (!%p1249_p1)
}
  0x47   : > { %1094 = dma.hbm_to_vmem [thread:$0]  (!%p1466_p11), %s1464_s14, 512, %s1470_s6, %s1472_s15, %s1326_s16, %s1326_s16, %s1327_s17  }
  0x48   : > { %p1762_p0 = scmp.ne.s32.totalorder %s1757_s26, 0 }
  0x49   : > { %s1506_s23 = sand.u32 (!%p1762_p0), 1, %s1315_s19   ;;  %p1763_p5 = scmp.ne.s32.totalorder (!%p1762_p0), %s1755_s24, 0 }
  0x4a   : > { %224 = sbr.rel (%p1762_p0) target bundleno = 1140 (0x474), region = 36  ;;  %s1017_s11 = sshll.u32 (!%p1762_p0), %s1506_s23, 5 }
  0x4b   : > { %s227_s12 = scalar_lea.sflag (!%p1762_p0), [#allocation3], %s1506_s23  ;;  %s1510_s13 = scalar_lea.vmem (!%p1762_p0), [#allocation2], %s1017_s11 }
  0x51   : > { %1298 = dma.done.wait (%p1763_p5), %s227_s12, 512  }
  0x52   : > { %1300 = vsyncadd (%p1763_p5), %s227_s12, 4294966784  ;;  %p1764_p11 = scmp.eq.s32.totalorder %s1382_s22, 0 }
  0x54   : > { %1302 = dma.done.wait (%p1764_p11), [#allocation6], 256   ;;  %p1765_p2 = pmov %p1764_p11 }
  0x55   : > { %v1141_v0 = vld [vmem:[#allocation5] sm:$0xff]   ;;  %v1142_v1 = vld [vmem:[#allocation5 + $0x8] sm:$0xff]   ;;  %vm322_vm0 = vcmask 261120   ;;  %v1145_v3 = vld [vmem:[%s1510_s13 + $0x10] sm:$0xff]   ;;  %vm423_vm1 = vcmask 523264   ;;  %v456_v48 = vlaneseq  ;;  %vm490_vm2 = vcmask 1041409  }
  0x56   : > { %1304 = vsyncadd (%p1765_p2), [#allocation6], 4294967040  ;;  %1063 = vmatprep.subr.bf16.mxu0 %v1141_v0  ;;  %1075 = vmatprep.subr.bf16.mxu1 %v1141_v0  ;;  %v1143_v2 = vld [vmem:[%s1510_s13] sm:$0xff]   ;;  %v1144_v4 = vld [vmem:[%s1510_s13 + $0x8] sm:$0xff]   ;;  %vm492_vm3 = vcmask 1042434   ;;  %vm494_vm4 = vcmask 1043459  }
  0x57   : > { %1064 = vmatpush3.bf16.msra.mxu0 %v1141_v0  ;;  %1077 = vmatpush3.bf16.msra.mxu1 %v1141_v0  ;;  %v1146_v5 = vld [vmem:[%s1510_s13 + $0x18] sm:$0xff]   ;;  %v1021_v6 = vld [vmem:[%s1748_s2] ss:$0 sm:$0xff]  ;;  %v457_v49 = vand.u32 127, %v456_v48  ;;  %v1542_v50 = vshrl.u32 %v456_v48, 7  ;;  %vm496_vm5 = vcmask 1044484  }
  0x58   : > { %1065 = vmatprep.subr.bf16.mxu0 %v1142_v1  ;;  %1067 = vmatprep.mubr.msk.bf16.mxu0 %vm322_vm0, %v1143_v2  ;;  %v1032_v23 = vld [vmem:[%s1749_s3] ss:$0 sm:$0xff]  ;;  %vm498_vm6 = vcmask 1045509   ;;  %vm500_vm7 = vcmask 1046534   ;;  %vm502_vm8 = vcmask 1047559   ;;  %vm505_vm9 = vcmask 64512  }
  0x59   : > { %1076 = vmatprep.subr.bf16.mxu1 %v1142_v1  ;;  %1071 = vmatprep.mubr.msk.bf16.mxu1 %vm322_vm0, %v1145_v3  ;;  %v1545_v53 = vsub.s32 %v457_v49, %v1542_v50  ;;  %p266_p4 = scmp.lt.s32.totalorder %s1382_s22, 1  ;;  %s1019_s28 = sshll.u32 %s1506_s23, 3 }
  0x5a   : > { %s1034_s27 = sshll.u32 %s1382_s22, 7  ;;  %s258_s10 = scalar_lea.vmem [#allocation7], %s1019_s28 }
  0x5b   : > { %1066 = vmatpush3.bf16.msra.mxu0 %v1142_v1  ;;  %1078 = vmatpush3.bf16.msra.mxu1 %v1142_v1  ;;  %s1667_s14 = scalar_select %p266_p4, %s1382_s22, 1 }
  0x5c   : > { %s902_s11 = sshll.u32 %s258_s10, 4  ;;  %s1700_s24 = scalar_lea.hbm %s1750_s4, %s1034_s27  ;;  %s1702_s11 = int_to_ptr.vmem [resolvable:$true] %s902_s11 }
  0x5d   : > { %s1020_s6 = sshll.u32 %s1667_s14, 3  ;;  %s885_s22 = scalar_lea.sflag [#allocation4], %s1506_s23 }
  0x5e   : > { %1068 = vmatmul.mubr.msk.bf16.vlgmr.msra.gmra.mrb[0].mxu0 %vm322_vm0, %v1144_v4  ;;  %1072 = vmatmul.mubr.msk.bf16.vlgmr.msra.gmra.mrb[0].mxu1 %vm322_vm0, %v1146_v5  ;;  %s269_s29 = scalar_lea.vmem %s1751_s5, %s1020_s6  ;;  %s1253_s26 = scalar_lea.vmem %s1702_s11, 128 }
  0x5f   : > { %p1254_p6 = scmp.ne.s32.totalorder %s1702_s11, %s1253_s26  ;;  %s1330_s16 = smov [#allocation7]  }
  0x60   : > { %s1257_s17 = sshll.u32 %s1330_s16, 4  ;;  %s1258_s17 = int_to_ptr.vmem [resolvable:$false] %s1257_s17 }
  0x61   : > { %p1255_p8 = pnand %p1254_p6, %p1455_p12  ;;  %s1259_s14 = scalar_lea.vmem %s1258_s17, 256 }
  0x62   : > { %p1260_p13 = scmp.lt.s32.totalorder %s1702_s11, %s1258_s17  ;;  %p1261_p3 = scmp.lt.s32.totalorder %s1259_s14, %s1253_s26 }
  0x63   : > { %p1256_p10 = pneg %p1255_p8 }
  0x64   : > { %p1262_p7 = por %p1261_p3, %p1260_p13 }
  0x66   : > { %p1263_p9 = pnand %p1262_p7, %p1256_p10 }
 0x131   : > { %v1069_v7 = vpop.f32.mrb[0].mxu0  ;;  %v1073_v8 = vpop.f32.mrb[0].mxu1 }
 0x132   : > { %v378_v9 = vadd.f32 %v1069_v7, %v1021_v6  ;;  %v369_v10 = vpop.f32.mrb[1].mxu0  ;;  %v385_v11 = vpop.f32.mrb[1].mxu1  ;;  %v394_v22 = vadd.f32 %v1073_v8, %v1021_v6 }
 0x133   : > { %v370_v12 = vadd.f32 %v1021_v6, %v369_v10  ;;  %v1070_v13 = vpop.f32.mrb[2].mxu0  ;;  %v1074_v14 = vpop.f32.mrb[2].mxu1  ;;  %v386_v19 = vadd.f32 %v1021_v6, %v385_v11 }
 0x134   : > { %1147 = vtanh.f32 %v378_v9  ;;  %v381_v15 = vadd.f32 %v1070_v13, %v1021_v6  ;;  %v372_v16 = vpop.f32.mrb[3].mxu0  ;;  %v388_v17 = vpop.f32.mrb[3].mxu1  ;;  %v397_v21 = vadd.f32 %v1074_v14, %v1021_v6  ;;  %v512_v13 = vsub.s32 0, %v1542_v50 }
 0x135   : > { %1149 = vtanh.f32 %v370_v12  ;;  %v373_v18 = vadd.f32 %v1021_v6, %v372_v16  ;;  %v389_v20 = vadd.f32 %v1021_v6, %v388_v17  ;;  %v1329_v12 = vmov 0  }
 0x136   : > { %1151 = vtanh.f32 %v381_v15  ;;  %1140 = vset.pattern.permute.xlu0 %v1329_v12  ;;  %1139 = vset.pattern.permute.xlu1 %v1329_v12  ;;  %v516_v14 = vsub.s32 1, %v1542_v50  ;;  %v520_v15 = vsub.s32 2, %v1542_v50  ;;  %v524_v16 = vsub.s32 3, %v1542_v50 }
 0x137   : > { %1153 = vtanh.f32 %v373_v18 }
 0x138   : > { %1155 = vtanh.f32 %v386_v19 }
 0x139   : > { %1157 = vtanh.f32 %v389_v20 }
 0x13a   : > { %1159 = vtanh.f32 %v397_v21  ;;  %v528_v21 = vsub.s32 4, %v1542_v50 }
 0x13b   : > { %1161 = vtanh.f32 %v394_v22 }
 0x13e   : > { %v1148_v24 = vpop.eup %1147 }
 0x13f   : > { %v1150_v25 = vpop.eup %1149  ;;  %v417_v26 = vmul.f32 %v1148_v24, %v1032_v23 }
 0x140   : > { %v1152_v27 = vpop.eup %1151  ;;  %v415_v28 = vmul.f32 %v1150_v25, %v1032_v23 }
 0x141   : > { %v1154_v29 = vpop.eup %1153  ;;  %v430_v30 = vsel %vm423_vm1, %v417_v26, 0.0  ;;  %v418_v31 = vmul.f32 %v1152_v27, %v1032_v23 }
 0x142   : > { %431 = vadd.xlane.f32.xlu1 %v430_v30  ;;  %v424_v32 = vsel %vm423_vm1, %v415_v28, 0.0  ;;  %v416_v33 = vmul.f32 %v1154_v29, %v1032_v23  ;;  %v1156_v34 = vpop.eup %1155  ;;  %v532_v28 = vsub.s32 5, %v1542_v50 }
 0x143   : > { %425 = vadd.xlane.f32.xlu0 %v424_v32  ;;  %v1158_v35 = vpop.eup %1157  ;;  %v433_v36 = vsel %vm423_vm1, %v418_v31, 0.0  ;;  %v419_v40 = vmul.f32 %v1156_v34, %v1032_v23  ;;  %v536_v32 = vsub.s32 6, %v1542_v50 }
 0x144   : > { %v1160_v37 = vpop.eup %1159  ;;  %v427_v38 = vsel %vm423_vm1, %v416_v33, 0.0  ;;  %v420_v39 = vmul.f32 %v1158_v35, %v1032_v23 }
 0x145   : > { %v1162_v41 = vpop.eup %1161  ;;  %v422_v43 = vmul.f32 %v1160_v37, %v1032_v23  ;;  %v436_v44 = vsel %vm423_vm1, %v419_v40, 0.0 }
 0x146   : > { %434 = vadd.xlane.f32.xlu1 %v433_v36  ;;  %v439_v42 = vsel %vm423_vm1, %v420_v39, 0.0  ;;  %v421_v45 = vmul.f32 %v1162_v41, %v1032_v23  ;;  %v540_v36 = vsub.s32 7, %v1542_v50 }
 0x147   : > { %428 = vadd.xlane.f32.xlu0 %v427_v38  ;;  %v445_v46 = vsel %vm423_vm1, %v422_v43, 0.0 }
 0x148   : > { %v442_v47 = vsel %vm423_vm1, %v421_v45, 0.0 }
 0x14a   : > { %440 = vadd.xlane.f32.xlu1 %v439_v42 }
 0x14b   : > { %437 = vadd.xlane.f32.xlu0 %v436_v44 }
 0x14e   : > { %446 = vadd.xlane.f32.xlu1 %v445_v46 }
 0x14f   : > { %443 = vadd.xlane.f32.xlu0 %v442_v47 }
 0x1cf   : > { %v432_v51 = vpop.xlane.xlu1 %431 }
 0x1d0   : > { %v426_v52 = vpop.xlane.xlu0 %425  ;;  %v469_v58 = vrot.slane %v432_v51, %v1545_v53 }
 0x1d1   : > { %v461_v56 = vrot.slane %v426_v52, %v1545_v53 }
 0x1d3   : > { %v435_v54 = vpop.xlane.xlu1 %434 }
 0x1d4   : > { %v429_v55 = vpop.xlane.xlu0 %428  ;;  %v473_v59 = vrot.slane %v435_v54, %v1545_v53 }
 0x1d5   : > { %v465_v57 = vrot.slane %v429_v55, %v1545_v53 }
 0x1d7   : > { %v491_v60 = vsel %vm490_vm2, %v465_v57, %v461_v56  ;;  %v441_v61 = vpop.xlane.xlu1 %440 }
 0x1d8   : > { %v493_v62 = vsel %vm492_vm3, %v469_v58, %v491_v60  ;;  %v438_v63 = vpop.xlane.xlu0 %437  ;;  %v481_v4 = vrot.slane %v441_v61, %v1545_v53 }
 0x1d9   : > { %v495_v0 = vsel %vm494_vm4, %v473_v59, %v493_v62  ;;  %v477_v1 = vrot.slane %v438_v63, %v1545_v53 }
 0x1db   : > { %v497_v2 = vsel %vm496_vm5, %v477_v1, %v495_v0  ;;  %v1556_v3 = vpop.xlane.xlu1 %446 }
 0x1dc   : > { %v444_v5 = vpop.xlane.xlu0 %443  ;;  %v489_v7 = vrot.slane %v1556_v3, %v1545_v53  ;;  %v499_v8 = vsel %vm498_vm6, %v481_v4, %v497_v2 }
 0x1dd   : > { %v485_v6 = vrot.slane %v444_v5, %v1545_v53 }
 0x1df   : > { %v501_v9 = vsel %vm500_vm7, %v485_v6, %v499_v8 }
 0x1e0   : > { %v503_v10 = vsel %vm502_vm8, %v489_v7, %v501_v9 }
 0x1e1   : > { %v506_v11 = vsel %vm505_vm9, %v503_v10, -inf }
 0x1e2   : > { %507 = vmax.xlane.f32.xlu0 %v506_v11 }
 0x26f   : > { %v508_v17 = vpop.xlane.xlu0 %507 }
 0x270   : > { %v513_v18 = vrot.slane %v508_v17, %v512_v13  ;;  %v517_v19 = vrot.slane %v508_v17, %v516_v14  ;;  %v521_v20 = vrot.slane %v508_v17, %v520_v15  ;;  %v525_v22 = vrot.slane %v508_v17, %v524_v16 }
 0x271   : > { %v529_v29 = vrot.slane %v508_v17, %v528_v21  ;;  %v533_v33 = vrot.slane %v508_v17, %v532_v28  ;;  %v537_v37 = vrot.slane %v508_v17, %v536_v32  ;;  %v541_v42 = vrot.slane %v508_v17, %v540_v36 }
 0x272   : > { %v550_v23 = vsub.f32 %v426_v52, %v513_v18  ;;  %v551_v24 = vsub.f32 %v429_v55, %v517_v19  ;;  %v552_v25 = vsub.f32 %v432_v51, %v521_v20  ;;  %v553_v30 = vsub.f32 %v435_v54, %v525_v22 }
 0x273   : > { %v554_v34 = vsub.f32 %v438_v63, %v529_v29  ;;  %v555_v38 = vsub.f32 %v441_v61, %v533_v33  ;;  %v556_v43 = vsub.f32 %v444_v5, %v537_v37  ;;  %v557_v46 = vsub.f32 %v1556_v3, %v541_v42  ;;  %v1054_v42 = vld [vmem:[%s1510_s13 + $0x8] sm:$0xff]  }
 0x274   : > { %v558_v26 = vmul.f32 1.442695, %v550_v23  ;;  %v560_v27 = vmul.f32 1.442695, %v551_v24  ;;  %v562_v31 = vmul.f32 1.442695, %v552_v25 }
 0x275   : > { %v564_v35 = vmul.f32 1.442695, %v553_v30  ;;  %v566_v39 = vmul.f32 1.442695, %v554_v34  ;;  %v568_v44 = vmul.f32 1.442695, %v555_v38 }
 0x276   : > { %1163 = vpow2.f32 %v558_v26  ;;  %v570_v47 = vmul.f32 1.442695, %v556_v43  ;;  %v572_v49 = vmul.f32 1.442695, %v557_v46  ;;  %v1044_v46 = vunpack.c.l.bf16 %v1054_v42 }
 0x277   : > { %1165 = vpow2.f32 %v560_v27 }
 0x278   : > { %1167 = vpow2.f32 %v562_v31 }
 0x279   : > { %1169 = vpow2.f32 %v564_v35 }
 0x27a   : > { %1171 = vpow2.f32 %v566_v39 }
 0x27b   : > { %1173 = vpow2.f32 %v568_v44 }
 0x27c   : > { %1175 = vpow2.f32 %v570_v47 }
 0x27d   : > { %1177 = vpow2.f32 %v572_v49 }
 0x280   : > { %v1164_v40 = vpop.eup %1163 }
 0x281   : > { %v1588_v41 = vpop.eup %1165  ;;  %583 = vperm.xlu1 %1139, %v1164_v40  }
 0x282   : > { %586 = vperm.xlu0 %1140, %v1588_v41   ;;  %v1593_v45 = vpop.eup %1167 }
 0x283   : > { %v1597_v48 = vpop.eup %1169 }
 0x284   : > { %v1600_v51 = vpop.eup %1171 }
 0x285   : > { %589 = vperm.xlu1 %1139, %v1593_v45   ;;  %v1603_v52 = vpop.eup %1173 }
 0x286   : > { %v1606_v54 = vpop.eup %1175 }
 0x287   : > { %v1609_v55 = vpop.eup %1177 }
 0x289   : > { %592 = vperm.xlu1 %1139, %v1597_v48  }
 0x28d   : > { %595 = vperm.xlu1 %1139, %v1600_v51  }
 0x291   : > { %598 = vperm.xlu1 %1139, %v1603_v52  }
 0x295   : > { %601 = vperm.xlu1 %1139, %v1606_v54  }
 0x299   : > { %604 = vperm.xlu1 %1139, %v1609_v55  }
 0x300   : > { %v584_v56 = vpop.permute.xlu1 %583 }
 0x301   : > { %v587_v60 = vpop.permute.xlu0 %586  ;;  %v609_v63 = vrot.slane %v584_v56, %v1545_v53  ;;  %v1055_v56 = vld [vmem:[%s1510_s13 + $0x10] sm:$0xff]  }
 0x302   : > { %v613_v62 = vrot.slane %v587_v60, %v1545_v53  ;;  %v1048_v60 = vunpack.c.l.bf16 %v1055_v56 }
 0x304   : > { %v590_v57 = vpop.permute.xlu1 %589  ;;  %v638_v4 = vsel %vm490_vm2, %v613_v62, %v609_v63 }
 0x305   : > { %v617_v0 = vrot.slane %v590_v57, %v1545_v53 }
 0x307   : > { %v639_v6 = vsel %vm492_vm3, %v617_v0, %v638_v4  ;;  %v1049_v4 = vunpack.c.h.bf16 %v1055_v56 }
 0x308   : > { %v593_v58 = vpop.permute.xlu1 %592 }
 0x309   : > { %v621_v1 = vrot.slane %v593_v58, %v1545_v53 }
 0x30b   : > { %v640_v8 = vsel %vm494_vm4, %v621_v1, %v639_v6  ;;  %v1056_v6 = vld [vmem:[%s1510_s13 + $0x18] sm:$0xff]  }
 0x30c   : > { %v596_v59 = vpop.permute.xlu1 %595 }
 0x30d   : > { %v625_v2 = vrot.slane %v596_v59, %v1545_v53 }
 0x30f   : > { %v641_v9 = vsel %vm496_vm5, %v625_v2, %v640_v8 }
 0x310   : > { %v599_v61 = vpop.permute.xlu1 %598 }
 0x311   : > { %v629_v5 = vrot.slane %v599_v61, %v1545_v53 }
 0x313   : > { %v642_v11 = vsel %vm498_vm6, %v629_v5, %v641_v9 }
 0x314   : > { %v602_v3 = vpop.permute.xlu1 %601 }
 0x315   : > { %v633_v7 = vrot.slane %v602_v3, %v1545_v53 }
 0x317   : > { %v643_v17 = vsel %vm500_vm7, %v633_v7, %v642_v11 }
 0x318   : > { %v605_v10 = vpop.permute.xlu1 %604 }
 0x319   : > { %v637_v12 = vrot.slane %v605_v10, %v1545_v53 }
 0x31b   : > { %v644_v18 = vsel %vm502_vm8, %v637_v12, %v643_v17 }
 0x31c   : > { %v646_v19 = vsel %vm505_vm9, %v644_v18, 0.0 }
 0x31d   : > { %647 = vadd.xlane.f32.xlu1 %v646_v19  ;;  %v1052_v19 = vunpack.c.l.bf16 %v1056_v6 }
 0x3aa   : > { %v648_v20 = vpop.xlane.xlu1 %647 }
 0x3ab   : > { %v653_v22 = vrot.slane %v648_v20, %v512_v13  ;;  %v657_v23 = vrot.slane %v648_v20, %v516_v14  ;;  %v661_v24 = vrot.slane %v648_v20, %v520_v15  ;;  %v665_v25 = vrot.slane %v648_v20, %v524_v16 }
 0x3ac   : > { %v669_v27 = vrot.slane %v648_v20, %v528_v21  ;;  %v673_v13 = vrot.slane %v648_v20, %v532_v28  ;;  %v677_v15 = vrot.slane %v648_v20, %v536_v32  ;;  %v681_v21 = vrot.slane %v648_v20, %v540_v36 }
 0x3ad   : > { %1179 = vrcp.f32 %v653_v22 }
 0x3ae   : > { %1181 = vrcp.f32 %v657_v23 }
 0x3af   : > { %1183 = vrcp.f32 %v661_v24 }
 0x3b0   : > { %1185 = vrcp.f32 %v665_v25 }
 0x3b1   : > { %1187 = vrcp.f32 %v669_v27 }
 0x3b2   : > { %1189 = vrcp.f32 %v673_v13 }
 0x3b3   : > { %1191 = vrcp.f32 %v677_v15  ;;  %v1053_v15 = vunpack.c.h.bf16 %v1056_v6 }
 0x3b4   : > { %1193 = vrcp.f32 %v681_v21 }
 0x3b7   : > { %v1180_v26 = vpop.eup %1179 }
 0x3b8   : > { %v691_v29 = vmul.f32 %v1180_v26, %v1164_v40  ;;  %v1182_v30 = vpop.eup %1181 }
 0x3b9   : > { %v693_v14 = vmul.f32 %v1182_v30, %v1588_v41  ;;  %v1184_v31 = vpop.eup %1183  ;;  %v1039_v41 = vld [vmem:[%s1510_s13] sm:$0xff]  }
 0x3ba   : > { %715 = vperm.xlu0 %1140, %v691_v29   ;;  %v695_v16 = vmul.f32 %v1184_v31, %v1593_v45  ;;  %v1186_v33 = vpop.eup %1185  ;;  %v1041_v43 = vunpack.c.h.bf16 %v1039_v41  ;;  %v1040_v44 = vunpack.c.l.bf16 %v1039_v41 }
 0x3bb   : > { %v697_v34 = vmul.f32 %v1186_v33, %v1597_v48  ;;  %v1188_v28 = vpop.eup %1187 }
 0x3bc   : > { %v699_v35 = vmul.f32 %v1188_v28, %v1600_v51  ;;  %v1190_v37 = vpop.eup %1189 }
 0x3bd   : > { %v701_v32 = vmul.f32 %v1190_v37, %v1603_v52  ;;  %v1192_v38 = vpop.eup %1191  ;;  %v1045_v52 = vunpack.c.h.bf16 %v1054_v42 }
 0x3be   : > { %718 = vperm.xlu0 %1140, %v693_v14   ;;  %v703_v39 = vmul.f32 %v1192_v38, %v1606_v54  ;;  %v1194_v40 = vpop.eup %1193 }
 0x3bf   : > { %v705_v50 = vmul.f32 %v1194_v40, %v1609_v55 }
 0x3c2   : > { %721 = vperm.xlu0 %1140, %v695_v16  }
 0x3c6   : > { %724 = vperm.xlu0 %1140, %v697_v34  }
 0x3ca   : > { %727 = vperm.xlu0 %1140, %v699_v35  }
 0x3ce   : > { %730 = vperm.xlu0 %1140, %v701_v32  }
 0x3d2   : > { %733 = vperm.xlu0 %1140, %v703_v39  }
 0x3d6   : > { %736 = vperm.xlu0 %1140, %v705_v50  }
 0x439   : > { %v716_v36 = vpop.permute.xlu0 %715 }
 0x43a   : > { %v803_v48 = vmul.f32 %v1040_v44, %v716_v36  ;;  %v741_v20 = vrot.slane %v716_v36, %v1545_v53 }
 0x43c   : > { %v811_v55 = vsel %vm322_vm0, %v803_v48, 0.0 }
 0x43d   : > { %v719_v45 = vpop.permute.xlu0 %718  ;;  %v812_v62 = vrot.slane %v811_v55, 4 }
 0x43e   : > { %v804_v47 = vmul.f32 %v1041_v43, %v719_v45  ;;  %v745_v17 = vrot.slane %v719_v45, %v1545_v53 }
 0x43f   : > { %v813_v7 = vadd.f32 %v812_v62, %v811_v55 }
 0x440   : > { %v818_v54 = vsel %vm322_vm0, %v804_v47, 0.0  ;;  %v770_v16 = vsel %vm490_vm2, %v745_v17, %v741_v20 }
 0x441   : > { %v722_v49 = vpop.permute.xlu0 %721  ;;  %v819_v61 = vrot.slane %v818_v54, 4  ;;  %v814_v25 = vrot.slane %v813_v7, 2 }
 0x442   : > { %v805_v51 = vmul.f32 %v1044_v46, %v722_v49  ;;  %v749_v23 = vrot.slane %v722_v49, %v1545_v53 }
 0x443   : > { %v820_v5 = vadd.f32 %v819_v61, %v818_v54  ;;  %v815_v38 = vadd.f32 %v814_v25, %v813_v7 }
 0x444   : > { %v825_v57 = vsel %vm322_vm0, %v805_v51, 0.0  ;;  %v771_v35 = vsel %vm492_vm3, %v749_v23, %v770_v16 }
 0x445   : > { %v725_v58 = vpop.permute.xlu0 %724  ;;  %v826_v63 = vrot.slane %v825_v57, 4  ;;  %v821_v22 = vrot.slane %v820_v5, 2 }
 0x446   : > { %v806_v59 = vmul.f32 %v1045_v52, %v725_v58  ;;  %v753_v27 = vrot.slane %v725_v58, %v1545_v53  ;;  %v816_v58 = vrot.slane %v815_v38, 1 }
 0x447   : > { %v827_v8 = vadd.f32 %v826_v63, %v825_v57  ;;  %v822_v28 = vadd.f32 %v821_v22, %v820_v5 }
 0x448   : > { %v832_v0 = vsel %vm322_vm0, %v806_v59, 0.0  ;;  %v772_v40 = vsel %vm494_vm4, %v753_v27, %v771_v35 }
 0x449   : > { %v833_v1 = vrot.slane %v832_v0, 4  ;;  %v728_v2 = vpop.permute.xlu0 %727  ;;  %v828_v26 = vrot.slane %v827_v8, 2  ;;  %v823_v49 = vrot.slane %v822_v28, 1 }
 0x44a   : > { %v807_v3 = vmul.f32 %v1048_v60, %v728_v2  ;;  %v757_v13 = vrot.slane %v728_v2, %v1545_v53 }
 0x44b   : > { %v834_v10 = vadd.f32 %v833_v1, %v832_v0  ;;  %v829_v39 = vadd.f32 %v828_v26, %v827_v8 }
 0x44c   : > { %v839_v9 = vsel %vm322_vm0, %v807_v3, 0.0  ;;  %v773_v41 = vsel %vm496_vm5, %v757_v13, %v772_v40  ;;  %v817_v3 = vadd.f32 %v816_v58, %v815_v38 }
 0x44d   : > { %v840_v11 = vrot.slane %v839_v9, 4  ;;  %v731_v12 = vpop.permute.xlu0 %730  ;;  %v835_v30 = vrot.slane %v834_v10, 2  ;;  %v830_v54 = vrot.slane %v829_v39, 1 }
 0x44e   : > { %v808_v18 = vmul.f32 %v1049_v4, %v731_v12  ;;  %v761_v21 = vrot.slane %v731_v12, %v1545_v53 }
 0x44f   : > { %v841_v24 = vadd.f32 %v840_v11, %v839_v9  ;;  %v836_v36 = vadd.f32 %v835_v30, %v834_v10  ;;  %v831_v2 = vadd.f32 %v830_v54, %v829_v39 }
 0x450   : > { %v846_v29 = vsel %vm322_vm0, %v808_v18, 0.0  ;;  %v774_v46 = vsel %vm498_vm6, %v761_v21, %v773_v41 }
 0x451   : > { %v847_v14 = vrot.slane %v846_v29, 4  ;;  %v734_v31 = vpop.permute.xlu0 %733  ;;  %v842_v33 = vrot.slane %v841_v24, 2  ;;  %v837_v59 = vrot.slane %v836_v36, 1 }
 0x452   : > { %v809_v34 = vmul.f32 %v1052_v19, %v734_v31  ;;  %v765_v32 = vrot.slane %v734_v31, %v1545_v53 }
 0x453   : > { %v848_v37 = vadd.f32 %v847_v14, %v846_v29  ;;  %v843_v45 = vadd.f32 %v842_v33, %v841_v24  ;;  %v838_v4 = vadd.f32 %v837_v59, %v836_v36 }
 0x454   : > { %v853_v50 = vsel %vm322_vm0, %v809_v34, 0.0  ;;  %v775_v52 = vsel %vm500_vm7, %v765_v32, %v774_v46 }
 0x455   : > { %v849_v42 = vrot.slane %v848_v37, 2  ;;  %v854_v43 = vrot.slane %v853_v50, 4  ;;  %v737_v44 = vpop.permute.xlu0 %736  ;;  %v844_v62 = vrot.slane %v843_v45, 1 }
 0x456   : > { %v769_v47 = vrot.slane %v737_v44, %v1545_v53  ;;  %v810_v48 = vmul.f32 %v1053_v15, %v737_v44  ;;  %v824_v53 = vadd.f32 %v823_v49, %v822_v28 }
 0x457   : > { %v850_v51 = vadd.f32 %v849_v42, %v848_v37  ;;  %v855_v56 = vadd.f32 %v854_v43, %v853_v50  ;;  %v845_v7 = vadd.f32 %v844_v62, %v843_v45 }
 0x458   : > { %v776_v55 = vsel %vm502_vm8, %v769_v47, %v775_v52  ;;  %v860_v57 = vsel %vm322_vm0, %v810_v48, 0.0  ;;  %v875_v8 = vsel %vm490_vm2, %v824_v53, %v817_v3 }
 0x459   : > { %v856_v60 = vrot.slane %v855_v56, 2  ;;  %778 = vst.msk [vmem:[%s269_s29] sm:$0xff] %vm505_vm9, %v776_v55  ;;  %v861_v61 = vrot.slane %v860_v57, 4  ;;  %v851_v63 = vrot.slane %v850_v51, 1  ;;  %v876_v11 = vsel %vm492_vm3, %v831_v2, %v875_v8 }
 0x45a   : > { %v877_v17 = vsel %vm494_vm4, %v838_v4, %v876_v11 }
 0x45b   : > { %v857_v0 = vadd.f32 %v856_v60, %v855_v56  ;;  %v862_v1 = vadd.f32 %v861_v61, %v860_v57  ;;  %v852_v9 = vadd.f32 %v851_v63, %v850_v51  ;;  %v878_v19 = vsel %vm496_vm5, %v845_v7, %v877_v17 }
 0x45d   : > { %v858_v5 = vrot.slane %v857_v0, 1  ;;  %v863_v6 = vrot.slane %v862_v1, 2  ;;  %v879_v20 = vsel %vm498_vm6, %v852_v9, %v878_v19 }
 0x45f   : > { %v864_v10 = vadd.f32 %v863_v6, %v862_v1  ;;  %v859_v12 = vadd.f32 %v858_v5, %v857_v0 }
 0x461   : > { %v865_v18 = vrot.slane %v864_v10, 1  ;;  %v880_v23 = vsel %vm500_vm7, %v859_v12, %v879_v20 }
 0x463   : > { %v866_v22 = vadd.f32 %v865_v18, %v864_v10 }
 0x465   : > { %v881_v24 = vsel %vm502_vm8, %v866_v22, %v880_v23 }
 0x466   : > { %883 = vst.msk [vmem:[%s258_s10] sm:$0xff] %vm322_vm0, %v881_v24 }
 0x467   : > { %1266 = shalt.err (!%p1263_p9)
}
 0x468   : > { %s1267_s23 = scalar_lea.hbm %s1700_s24, 128  ;;  %s1271_s15 = scalar_lea.hbm %s1750_s4, 256 }
 0x469   : > { %p1268_p1 = scmp.ne.s32.totalorder %s1700_s24, %s1267_s23  ;;  %p1272_p11 = scmp.lt.u32.totalorder %s1700_s24, %s1750_s4 }
 0x46a   : > { %p1273_p2 = scmp.lt.u32.totalorder %s1271_s15, %s1267_s23  ;;  %p1275_p6 = scmp.lt.u32.totalorder %s1267_s23, %s1700_s24 }
 0x46b   : > { %p1269_p0 = pnand %p1268_p1, %p1455_p12 }
 0x46c   : > { %p1274_p4 = por %p1273_p2, %p1272_p11 }
 0x46d   : > { %p1270_p5 = pneg %p1269_p0 }
 0x46e   : > { %p1276_p8 = por %p1275_p6, %p1274_p4 }
 0x470   : > { %p1277_p10 = pnand %p1276_p8, %p1270_p5 }
 0x472   : > { %1280 = shalt.err (!%p1277_p10)
}
 0x473   : > { %1085 = dma.vmem_to_hbm [thread:$0]  (%p1455_p12), %s1702_s11, 128, %s1700_s24, %s885_s22  }
 0x474 PF: > { %s917_s27 = sand.u32 1, %s1311_s18   ;;  %p1766_p13 = scmp.ne.s32.totalorder %s1756_s25, 0 }
 0x475   : > { %p1767_p3 = scmp.ge.s32.totalorder %s1323_s21, 2  ;;  %s918_s10 = scalar_lea.sflag [#allocation4], %s917_s27 }
 0x477   : > { %p1096_p7 = pnand %p1767_p3, %p1766_p13 }
 0x479   : > { %1306 = dma.done.wait (!%p1096_p7), %s918_s10, 128  }
 0x47a   : > { %1308 = vsyncadd (!%p1096_p7), %s918_s10, 4294967168  ;;  %p20_p9 = scmp.ge.s32.totalorder %s1417_s30, 4   ;;  %s1768_s18 = smov %s1315_s19 }
 0x47b   : > { %s1769_s19 = smov %s1319_s20  ;;  %s1770_s20 = smov %s1451_s8 }
 0x47c   : > { %s1771_s21 = smov %s1417_s30  ;;  %22 = sbr.rel (!%p20_p9) target bundleno = 6 (0x6), region = 97 }
 0x483   :  { %930 = vsyncpa [#allocation3], 1 }
 0x484   :  { %932 = vsyncpa [#allocation3 + $0x1], 1 }
 0x485   :  { %933 = vsyncpa [#allocation6], 1 }
 0x486   :  { %934 = vsyncpa [#allocation4], 1 }
 0x487   :  { %936 = vsyncpa [#allocation4 + $0x1], 1 }

</bundles_post_ra>
